<compile_context>
chip_gen: v5e
topology: v5e:2x2
jax: 0.10.0
libtpu: 0.0.40
codegen_flags: <defaults>
</compile_context>

<pallas_src>
import jax
import jax.numpy as jnp
import numpy as np
from jax.experimental import pallas as pl
from jax.experimental.pallas import tpu as pltpu

D_IN, D_H1, D_H2, D_OUT = 8, 16, 8, 2


def _round_up(n, m):
    return ((n + m - 1) // m) * m


def _mlp_kernel(xT_ref, w1t_ref, b1_ref, w2t_ref, b2_ref, w3t_ref, b3_ref, o_ref):
    # Batch-on-lanes layout:
    #   xT_ref : (8, TB)    w1t: (16, 8)  b1: (16, 1)
    #   h1     : (16, TB)   w2t: (8, 16)  b2: (8, 1)
    #   h2     : (8, TB)    w3t: (2, 8)   b3: (2, 1)
    #   o_ref  : (2, TB)
    x = xT_ref[...].astype(jnp.float32)

    # Linear(8,16) + ReLU   (Dropout(0.1) -> identity in eval)
    h1 = jnp.dot(w1t_ref[...], x, preferred_element_type=jnp.float32) + b1_ref[...]
    h1 = jnp.maximum(h1, 0.0)

    # Linear(16,8) + ReLU   (Dropout(0.1) -> identity in eval)
    h2 = jnp.dot(w2t_ref[...], h1, preferred_element_type=jnp.float32) + b2_ref[...]
    h2 = jnp.maximum(h2, 0.0)

    # Linear(8,2)
    out = jnp.dot(w3t_ref[...], h2, preferred_element_type=jnp.float32) + b3_ref[...]
    o_ref[...] = out.astype(o_ref.dtype)


def incomplete_cls_forward(x, params, *, tb=1024):
    """x: (B, 1, 8) float32  ->  (B, 2) float32 (matches PyTorch squeeze(1))."""
    B = x.shape[0]
    x2d = x.reshape(B, D_IN).astype(jnp.float32)

    # Batch-on-lanes: (8, B_pad), padded so the lane dim tiles into TB chunks.
    TB = min(tb, _round_up(B, 128))
    B_pad = _round_up(B, TB)
    xT = jnp.zeros((D_IN, B_pad), jnp.float32).at[:, :B].set(x2d.T)

    w1t, b1, w2t, b2, w3t, b3 = params

    grid = (B_pad // TB,)

    # Weights/biases: whole array, constant block index -> resident in VMEM.
    resident = lambda a: pl.BlockSpec(a.shape, lambda i: (0, 0))

    flops = 2 * B_pad * (D_IN * D_H1 + D_H1 * D_H2 + D_H2 * D_OUT)
    weight_bytes = 4 * (w1t.size + b1.size + w2t.size + b2.size + w3t.size + b3.size)
    bytes_accessed = 4 * B_pad * (D_IN + D_OUT) + weight_bytes

    outT = pl.pallas_call(
        _mlp_kernel,
        out_shape=jax.ShapeDtypeStruct((D_OUT, B_pad), jnp.float32),
        grid=grid,
        in_specs=[
            pl.BlockSpec((D_IN, TB), lambda i: (0, i)),   # x tile, pipelined over batch
            resident(w1t), resident(b1),
            resident(w2t), resident(b2),
            resident(w3t), resident(b3),
        ],
        out_specs=pl.BlockSpec((D_OUT, TB), lambda i: (0, i)),  # lane-dense output
        compiler_params=pltpu.CompilerParams(
            dimension_semantics=("parallel",)),  # v7x: shard batch tiles over 2 TCs
        cost_estimate=pl.CostEstimate(
            flops=flops, bytes_accessed=bytes_accessed, transcendentals=0),
    )(xT, w1t, b1, w2t, b2, w3t, b3)

    # Drop batch padding and transpose back to (B, 2).
    return outT[:, :B].T


def init_params(key):
    """Deterministic init mimicking torch.nn.Linear defaults: U(-1/sqrt(fan_in), +1/sqrt(fan_in)).

    Weights are stored transposed ((out, in)) and biases as (out, 1) to match
    the batch-on-lanes kernel layout.
    """
    ks = jax.random.split(key, 6)

    def lin(kw, kb, fan_in, fan_out):
        bound = 1.0 / np.sqrt(fan_in)
        wt = jax.random.uniform(kw, (fan_out, fan_in), jnp.float32, -bound, bound)
        b = jax.random.uniform(kb, (fan_out, 1), jnp.float32, -bound, bound)
        return wt, b

    w1t, b1 = lin(ks[0], ks[1], D_IN, D_H1)
    w2t, b2 = lin(ks[2], ks[3], D_H1, D_H2)
    w3t, b3 = lin(ks[4], ks[5], D_H2, D_OUT)
    return (w1t, b1, w2t, b2, w3t, b3)


def _reference_forward(x, params):
    """Pure-JAX reference of the same semantics (dropout = identity)."""
    w1t, b1, w2t, b2, w3t, b3 = params
    h = x.reshape(x.shape[0], D_IN)
    h = jnp.maximum(h @ w1t.T + b1.T, 0.0)
    h = jnp.maximum(h @ w2t.T + b2.T, 0.0)
    return h @ w3t.T + b3.T


if __name__ == "__main__":
    key = jax.random.PRNGKey(0)
    k_x, k_p = jax.random.split(key)

    B = 8
    x = jax.random.normal(k_x, (B, 1, D_IN), dtype=jnp.float32)
    params = init_params(k_p)

    out = incomplete_cls_forward(x, params)
    out = jax.block_until_ready(out)

    ref = _reference_forward(x, params)
    assert out.shape == (B, D_OUT), out.shape
    np.testing.assert_allclose(np.asarray(out), np.asarray(ref), rtol=1e-5, atol=1e-5)

    print("KERNEL_OK")
</pallas_src>

<mosaic_0001>
module attributes {stable_mosaic.version = 11 : i64} {
  func.func @_mlp_kernel(%arg0: i32, %arg1: memref<8x128xf32, #tpu.memory_space<vmem>>, %arg2: memref<16x8xf32, #tpu.memory_space<vmem>>, %arg3: memref<16x1xf32, #tpu.memory_space<vmem>>, %arg4: memref<8x16xf32, #tpu.memory_space<vmem>>, %arg5: memref<8x1xf32, #tpu.memory_space<vmem>>, %arg6: memref<2x8xf32, #tpu.memory_space<vmem>>, %arg7: memref<2x1xf32, #tpu.memory_space<vmem>>, %arg8: memref<2x128xf32, #tpu.memory_space<vmem>>) attributes {dimension_semantics = [#tpu.dimension_semantics<parallel>], iteration_bounds = array<i64: 1>, scalar_prefetch = 0 : i64, scratch_operands = 0 : i64, tpu.core_type = #tpu.core_type<tc>, window_params = [{transform_indices = @transform_0, window_bounds = array<i64: 8, 128>}, {pipeline_mode = #tpu.pipeline_mode<synchronous>, transform_indices = @transform_1, window_bounds = array<i64: 16, 8>}, {pipeline_mode = #tpu.pipeline_mode<synchronous>, transform_indices = @transform_2, window_bounds = array<i64: 16, 1>}, {pipeline_mode = #tpu.pipeline_mode<synchronous>, transform_indices = @transform_3, window_bounds = array<i64: 8, 16>}, {pipeline_mode = #tpu.pipeline_mode<synchronous>, transform_indices = @transform_4, window_bounds = array<i64: 8, 1>}, {pipeline_mode = #tpu.pipeline_mode<synchronous>, transform_indices = @transform_5, window_bounds = array<i64: 2, 8>}, {pipeline_mode = #tpu.pipeline_mode<synchronous>, transform_indices = @transform_6, window_bounds = array<i64: 2, 1>}, {transform_indices = @transform_7, window_bounds = array<i64: 2, 128>}]} {
    %c0 = arith.constant 0 : index
    %c0_0 = arith.constant 0 : index
    %0 = vector.load %arg1[%c0, %c0_0] : memref<8x128xf32, #tpu.memory_space<vmem>>, vector<8x128xf32>
    %c0_1 = arith.constant 0 : index
    %c0_2 = arith.constant 0 : index
    %1 = vector.load %arg2[%c0_1, %c0_2] : memref<16x8xf32, #tpu.memory_space<vmem>>, vector<16x8xf32>
    %cst = arith.constant dense<0.000000e+00> : vector<16x128xf32>
    %2 = tpu.matmul %1, %0, %cst {dimension_numbers = #tpu.dot_dimension_numbers<[1], [0], [0], [1], [0, 0, 1, 1], [], []>} : vector<16x8xf32>, vector<8x128xf32>, vector<16x128xf32> -> vector<16x128xf32>
    %c0_3 = arith.constant 0 : index
    %c0_4 = arith.constant 0 : index
    %3 = vector.load %arg3[%c0_3, %c0_4] : memref<16x1xf32, #tpu.memory_space<vmem>>, vector<16x1xf32>
    %4 = vector.broadcast %3 : vector<16x1xf32> to vector<16x128xf32>
    %5 = arith.addf %2, %4 : vector<16x128xf32>
    %cst_5 = arith.constant 0.000000e+00 : f32
    %6 = vector.broadcast %cst_5 : f32 to vector<16x128xf32>
    %7 = arith.maximumf %5, %6 : vector<16x128xf32>
    %c0_6 = arith.constant 0 : index
    %c0_7 = arith.constant 0 : index
    %8 = vector.load %arg4[%c0_6, %c0_7] : memref<8x16xf32, #tpu.memory_space<vmem>>, vector<8x16xf32>
    %cst_8 = arith.constant dense<0.000000e+00> : vector<8x128xf32>
    %9 = tpu.matmul %8, %7, %cst_8 {dimension_numbers = #tpu.dot_dimension_numbers<[1], [0], [0], [1], [0, 0, 1, 1], [], []>} : vector<8x16xf32>, vector<16x128xf32>, vector<8x128xf32> -> vector<8x128xf32>
    %c0_9 = arith.constant 0 : index
    %c0_10 = arith.constant 0 : index
    %10 = vector.load %arg5[%c0_9, %c0_10] : memref<8x1xf32, #tpu.memory_space<vmem>>, vector<8x1xf32>
    %11 = vector.broadcast %10 : vector<8x1xf32> to vector<8x128xf32>
    %12 = arith.addf %9, %11 : vector<8x128xf32>
    %cst_11 = arith.constant 0.000000e+00 : f32
    %13 = vector.broadcast %cst_11 : f32 to vector<8x128xf32>
    %14 = arith.maximumf %12, %13 : vector<8x128xf32>
    %c0_12 = arith.constant 0 : index
    %c0_13 = arith.constant 0 : index
    %15 = vector.load %arg6[%c0_12, %c0_13] : memref<2x8xf32, #tpu.memory_space<vmem>>, vector<2x8xf32>
    %cst_14 = arith.constant dense<0.000000e+00> : vector<2x128xf32>
    %16 = tpu.matmul %15, %14, %cst_14 {dimension_numbers = #tpu.dot_dimension_numbers<[1], [0], [0], [1], [0, 0, 1, 1], [], []>} : vector<2x8xf32>, vector<8x128xf32>, vector<2x128xf32> -> vector<2x128xf32>
    %c0_15 = arith.constant 0 : index
    %c0_16 = arith.constant 0 : index
    %17 = vector.load %arg7[%c0_15, %c0_16] : memref<2x1xf32, #tpu.memory_space<vmem>>, vector<2x1xf32>
    %18 = vector.broadcast %17 : vector<2x1xf32> to vector<2x128xf32>
    %19 = arith.addf %16, %18 : vector<2x128xf32>
    %c0_17 = arith.constant 0 : index
    %c0_18 = arith.constant 0 : index
    %20 = vector.load %arg8[%c0_17, %c0_18] : memref<2x128xf32, #tpu.memory_space<vmem>>, vector<2x128xf32>
    tpu.vector_store %arg8[%c0_17, %c0_18], %19 {strides = array<i32>} : memref<2x128xf32, #tpu.memory_space<vmem>>, vector<2x128xf32>,
    return
  }
  func.func @transform_0(%arg0: i32) -> (i32, i32) {
    %c0_i32 = arith.constant 0 : i32
    %c0_i32_0 = arith.constant 0 : i32
    return %c0_i32, %arg0 : i32, i32
  }
  func.func @transform_1(%arg0: i32) -> (i32, i32) {
    %c0_i32 = arith.constant 0 : i32
    %c0_i32_0 = arith.constant 0 : i32
    %c0_i32_1 = arith.constant 0 : i32
    return %c0_i32, %c0_i32_0 : i32, i32
  }
  func.func @transform_2(%arg0: i32) -> (i32, i32) {
    %c0_i32 = arith.constant 0 : i32
    %c0_i32_0 = arith.constant 0 : i32
    %c0_i32_1 = arith.constant 0 : i32
    return %c0_i32, %c0_i32_0 : i32, i32
  }
  func.func @transform_3(%arg0: i32) -> (i32, i32) {
    %c0_i32 = arith.constant 0 : i32
    %c0_i32_0 = arith.constant 0 : i32
    %c0_i32_1 = arith.constant 0 : i32
    return %c0_i32, %c0_i32_0 : i32, i32
  }
  func.func @transform_4(%arg0: i32) -> (i32, i32) {
    %c0_i32 = arith.constant 0 : i32
    %c0_i32_0 = arith.constant 0 : i32
    %c0_i32_1 = arith.constant 0 : i32
    return %c0_i32, %c0_i32_0 : i32, i32
  }
  func.func @transform_5(%arg0: i32) -> (i32, i32) {
    %c0_i32 = arith.constant 0 : i32
    %c0_i32_0 = arith.constant 0 : i32
    %c0_i32_1 = arith.constant 0 : i32
    return %c0_i32, %c0_i32_0 : i32, i32
  }
  func.func @transform_6(%arg0: i32) -> (i32, i32) {
    %c0_i32 = arith.constant 0 : i32
    %c0_i32_0 = arith.constant 0 : i32
    %c0_i32_1 = arith.constant 0 : i32
    return %c0_i32, %c0_i32_0 : i32, i32
  }
  func.func @transform_7(%arg0: i32) -> (i32, i32) {
    %c0_i32 = arith.constant 0 : i32
    %c0_i32_0 = arith.constant 0 : i32
    return %c0_i32, %arg0 : i32, i32
  }
}

</mosaic_0001>

<bundles_post_ra>
// kernel: tpu_custom_call.1
= control target key start
LH: loop header
LB: loop body
LE: loop exit
PB: predicated region body
PF: predicated region fallthrough
CT: control target
= control target key end

     0   :  { %vm42_vm0 = vcmask 64512   ;;  %s263_s0 = inlined_call_operand.vmem [shape: f32[8,128], index: 0, kind: input, shape index: {}]   ;;  %s264_s1 = inlined_call_operand.vmem [shape: f32[16,8], index: 1, kind: input, shape index: {}]   ;;  %s265_s2 = inlined_call_operand.vmem [shape: f32[16,1], index: 2, kind: input, shape index: {}]   ;;  %s266_s3 = inlined_call_operand.vmem [shape: f32[8,16], index: 3, kind: input, shape index: {}]   ;;  %s267_s4 = inlined_call_operand.vmem [shape: f32[8,1], index: 4, kind: input, shape index: {}]   ;;  %s268_s5 = inlined_call_operand.vmem [shape: f32[2,8], index: 5, kind: input, shape index: {}]   ;;  %s269_s6 = inlined_call_operand.vmem [shape: f32[2,1], index: 6, kind: input, shape index: {}]   ;;  %s270_s7 = inlined_call_operand.hbm [shape: f32[2,128], index: 7, kind: output, shape index: {}]  }
   0x1   :  { %v27_v0 = vld [vmem:[%s263_s0] sm:$0xff]  ;;  %v29_v2 = vld [vmem:[%s264_s1 + $0x8] sm:$0xff] }
   0x2   :  { %v28_v1 = vld [vmem:[%s264_s1] sm:$0xff]  ;;  %64 = vmatpush.msra.mxu0 %v27_v0  ;;  %157 = vmatpush.msra.mxu3 %v27_v0  ;;  %v31_v3 = vld [vmem:[%s265_s2 + $0x8] sm:$0xff] }
   0x3   :  { %12 = vsyncpa [#allocation3], 0  ;;  %153 = vmatmul.msk.f32.vlgmr.msra.gmra.mxu0 %vm42_vm0, %v28_v1  ;;  %154 = vmatmul.msk.f32.vlgmr.msra.gmra.mxu3 %vm42_vm0, %v29_v2  ;;  %v188_v4 = vmov 0   ;;  %v30_v5 = vld [vmem:[%s265_s2] sm:$0xff]  ;;  %vm81_vm1 = vcmask 130048   ;;  %s189_s14 = smov [#allocation2]  }
   0x4   :  { %160 = vset.pattern.permute.xlu0 %v188_v4  ;;  %161 = vset.pattern.permute.xlu1 %v188_v4  ;;  %v75_v6 = vld [vmem:[%s267_s4] sm:$0xff]  ;;  %s142_s15 = sshll.u32 %s189_s14, 4  ;;  %s143_s15 = int_to_ptr.vmem [resolvable:$true] %s142_s15 }
   0x5   :  { %39 = vperm.xlu0 %160, %v31_v3   ;;  %78 = vperm.xlu1 %161, %v75_v6   ;;  %v107_v7 = vld [vmem:[%s269_s6] sm:$0x3] }
   0x6   :  { %v74_v16 = vld [vmem:[%s266_s3] sm:$0xff]  ;;  %s144_s3 = sshll.u32 %s270_s7, 4  ;;  %s145_s3 = int_to_ptr.hbm [resolvable:$true] %s144_s3 }
   0x7   :  { %v106_v21 = vld [vmem:[%s268_s5] sm:$0x3] }
   0xd   :  { %34 = vperm.xlu0 %160, %v30_v5   ;;  %110 = vperm.xlu1 %161, %v107_v7  }
  0x77   :  { %v40_v8 = vpop.permute.xlu0 %39  ;;  %v79_v17 = vpop.permute.xlu1 %78 }
  0x7f   :  { %v35_v9 = vpop.permute.xlu0 %34  ;;  %v111_v22 = vpop.permute.xlu1 %110 }
  0x80   :  { %v66_v10 = vpop.f32.mrf.mxu0 }
  0x81   :  { %v67_v12 = vadd.f32 %v66_v10, %v35_v9 }
  0x83   :  { %v72_v15 = vmax.f32 %v67_v12, 0.0 }
  0x86   :  { %v69_v11 = vpop.f32.mrf.mxu3 }
  0x87   :  { %v70_v13 = vadd.f32 %v69_v11, %v40_v8 }
  0x89   :  { %v73_v14 = vmax.f32 %v70_v13, 0.0 }
  0x8b   :  { %99 = vmatpush.msra.mxu1 %v73_v14 }
  0x8d   :  { %100 = vmatpush.msra.mxu1 %v72_v15 }
  0x8e   :  { %155 = vmatmul.msk.f32.vlgmr.msra.gmra.mxu1 %vm81_vm1, %v74_v16 }
 0x10b   :  { %v102_v18 = vpop.f32.mrf.mxu1 }
 0x10c   :  { %v103_v19 = vadd.f32 %v102_v18, %v79_v17 }
 0x10e   :  { %v105_v20 = vmax.f32 %v103_v19, 0.0 }
 0x110   :  { %131 = vmatpush.msra.mxu2 %v105_v20 }
 0x111   :  { %156 = vmatmul.msk.f32.vlgmr.msra.gmra.mxu2 %vm42_vm0, %v106_v21 }
 0x194   :  { %v133_v23 = vpop.f32.mrf.mxu2 }
 0x195   :  { %v134_v24 = vadd.f32 %v133_v23, %v111_v22 }
 0x197   :  { %136 = vst [vmem:[#allocation2] sm:$0x3] %v134_v24 }
 0x198   :  { %147 = dma.vmem_to_hbm [thread:$0]  %s143_s15, 32, %s145_s3, [#allocation3]  }
 0x199   :  { %186 = dma.done.wait [#allocation3], 32  }
 0x19a   :  { %187 = vsyncadd [#allocation3], 4294967264 }
 0x19b   :  { %152 = vsyncpa [#allocation3], 1 }

</bundles_post_ra>
